<compile_context>
chip_gen: v7x
topology: tpu7x:2x2x1
jax: 0.10.0
libtpu: 0.0.40
codegen_flags: <defaults>
</compile_context>

<pallas_src>
import functools

import jax
import jax.numpy as jnp
from jax.experimental import pallas as pl
from jax.experimental.pallas import tpu as pltpu


def _ada_rmsnorm_kernel(x_ref, gamma_ref, beta_ref, o_ref, *, scale, eps):
    # x_ref     : (1, TN, D)
    # gamma_ref : (1, 1, D)   per-batch gamma row
    # beta_ref  : (1, 1, D)   per-batch beta row
    # o_ref     : (1, TN, D)
    x = x_ref[0].astype(jnp.float32)                       # (TN, D)
    sumsq = jnp.sum(x * x, axis=-1, keepdims=True)         # (TN, 1) cross-lane reduce
    # F.normalize: x / max(||x||_2, eps); then * sqrt(D)
    inv = scale / jnp.maximum(jnp.sqrt(sumsq), eps)        # (TN, 1)
    g = gamma_ref[0].astype(jnp.float32)                   # (1, D) broadcast over rows
    b = beta_ref[0].astype(jnp.float32)                    # (1, D)
    o_ref[0] = (x * inv * g + b).astype(o_ref.dtype)


def _choose_tn(n, target=1024):
    """Largest sequence tile <= target that divides N (multiple of 8 when possible)."""
    if n <= target:
        return n
    for tn in range(min(target, n), 7, -1):
        if n % tn == 0 and tn % 8 == 0:
            return tn
    return n  # fallback: whole sequence per block


def adaptive_rms_norm(x, cond, w_gamma, b_gamma, w_beta, b_beta,
                      *, eps=1e-12, tn=None):
    """x: (B, N, D); cond: (B, cond_dim); Linear params in nn.Linear layout
    (weight: (D, cond_dim), bias: (D,))."""
    B, N, D = x.shape
    scale = float(D) ** 0.5

    # cond -> gamma / beta projections: tiny matmuls, negligible HBM traffic.
    gamma = (cond @ w_gamma.T + b_gamma).astype(x.dtype)[:, None, :]   # (B, 1, D)
    beta = (cond @ w_beta.T + b_beta).astype(x.dtype)[:, None, :]      # (B, 1, D)

    tn = _choose_tn(N) if tn is None else tn
    kernel = functools.partial(_ada_rmsnorm_kernel, scale=scale, eps=eps)

    return pl.pallas_call(
        kernel,
        out_shape=jax.ShapeDtypeStruct((B, N, D), x.dtype),
        grid_spec=pltpu.PrefetchScalarGridSpec(
            num_scalar_prefetch=0,
            grid=(B, N // tn),
            in_specs=[
                pl.BlockSpec((1, tn, D), lambda b, n: (b, n, 0)),   # x tile
                pl.BlockSpec((1, 1, D), lambda b, n: (b, 0, 0)),    # gamma row
                pl.BlockSpec((1, 1, D), lambda b, n: (b, 0, 0)),    # beta row
            ],
            out_specs=pl.BlockSpec((1, tn, D), lambda b, n: (b, n, 0)),
        ),
        compiler_params=pltpu.CompilerParams(
            dimension_semantics=("parallel", "parallel")),
    )(x, gamma, beta)


def _reference(x, cond, w_gamma, b_gamma, w_beta, b_beta, eps=1e-12):
    D = x.shape[-1]
    norm = jnp.sqrt(jnp.sum(x * x, axis=-1, keepdims=True))
    normed = x / jnp.maximum(norm, eps) * jnp.sqrt(jnp.float32(D))
    gamma = cond @ w_gamma.T + b_gamma
    beta = cond @ w_beta.T + b_beta
    return normed * gamma[:, None, :] + beta[:, None, :]


if __name__ == "__main__":
    B, N, D, COND = 2, 16, 32, 32

    key = jax.random.PRNGKey(0)
    kx, kc, kwg, kbg, kwb, kbb = jax.random.split(key, 6)

    x = jax.random.normal(kx, (B, N, D), jnp.float32)
    cond = jax.random.normal(kc, (B, COND), jnp.float32)

    # nn.Linear layout: weight (out_dim, in_dim), bias (out_dim,).
    # Module inits weight=0 / bias=1 (gamma) and 0 (beta); use small random
    # perturbations so the test actually exercises the conditioning path.
    w_gamma = 0.02 * jax.random.normal(kwg, (D, COND), jnp.float32)
    b_gamma = jnp.ones((D,), jnp.float32) + 0.01 * jax.random.normal(kbg, (D,), jnp.float32)
    w_beta = 0.02 * jax.random.normal(kwb, (D, COND), jnp.float32)
    b_beta = 0.01 * jax.random.normal(kbb, (D,), jnp.float32)

    out = adaptive_rms_norm(x, cond, w_gamma, b_gamma, w_beta, b_beta)
    out = jax.block_until_ready(out)

    ref = _reference(x, cond, w_gamma, b_gamma, w_beta, b_beta)
    assert out.shape == (B, N, D)
    assert jnp.allclose(out, ref, atol=1e-5, rtol=1e-5), "mismatch vs reference"

    print("KERNEL_OK")
</pallas_src>

<mosaic_0001>
module attributes {stable_mosaic.version = 11 : i64} {
  func.func @_ada_rmsnorm_kernel(%arg0: i32, %arg1: i32, %arg2: memref<1x16x32xf32, #tpu.memory_space<vmem>>, %arg3: memref<1x1x32xf32, #tpu.memory_space<vmem>>, %arg4: memref<1x1x32xf32, #tpu.memory_space<vmem>>, %arg5: memref<1x16x32xf32, #tpu.memory_space<vmem>>) attributes {dimension_semantics = [#tpu.dimension_semantics<parallel>, #tpu.dimension_semantics<parallel>], iteration_bounds = array<i64: 2, 1>, scalar_prefetch = 0 : i64, scratch_operands = 0 : i64, tpu.core_type = #tpu.core_type<tc>, window_params = [{transform_indices = @transform_0, window_bounds = array<i64: 1, 16, 32>}, {transform_indices = @transform_1, window_bounds = array<i64: 1, 1, 32>}, {transform_indices = @transform_2, window_bounds = array<i64: 1, 1, 32>}, {transform_indices = @transform_3, window_bounds = array<i64: 1, 16, 32>}]} {
    %c0 = arith.constant 0 : index
    %c0_0 = arith.constant 0 : index
    %c0_1 = arith.constant 0 : index
    %0 = vector.load %arg2[%c0, %c0_0, %c0_1] : memref<1x16x32xf32, #tpu.memory_space<vmem>>, vector<1x16x32xf32>
    %1 = vector.shape_cast %0 : vector<1x16x32xf32> to vector<16x32xf32>
    %2 = arith.mulf %1, %1 : vector<16x32xf32>
    %cst = arith.constant dense<0.000000e+00> : vector<16xf32>
    %3 = vector.multi_reduction <add>, %2, %cst [1] : vector<16x32xf32> to vector<16xf32>
    %4 = vector.shape_cast %3 : vector<16xf32> to vector<16x1xf32>
    %5 = math.sqrt %4 : vector<16x1xf32>
    %cst_2 = arith.constant 9.99999996E-13 : f32
    %6 = vector.broadcast %cst_2 : f32 to vector<16x1xf32>
    %7 = arith.maximumf %5, %6 : vector<16x1xf32>
    %cst_3 = arith.constant 5.65685415 : f32
    %8 = vector.broadcast %cst_3 : f32 to vector<16x1xf32>
    %9 = arith.divf %8, %7 : vector<16x1xf32>
    %c0_4 = arith.constant 0 : index
    %c0_5 = arith.constant 0 : index
    %c0_6 = arith.constant 0 : index
    %10 = vector.load %arg3[%c0_4, %c0_5, %c0_6] : memref<1x1x32xf32, #tpu.memory_space<vmem>>, vector<1x1x32xf32>
    %11 = vector.shape_cast %10 : vector<1x1x32xf32> to vector<1x32xf32>
    %c0_7 = arith.constant 0 : index
    %c0_8 = arith.constant 0 : index
    %c0_9 = arith.constant 0 : index
    %12 = vector.load %arg4[%c0_7, %c0_8, %c0_9] : memref<1x1x32xf32, #tpu.memory_space<vmem>>, vector<1x1x32xf32>
    %13 = vector.shape_cast %12 : vector<1x1x32xf32> to vector<1x32xf32>
    %14 = vector.broadcast %9 : vector<16x1xf32> to vector<16x32xf32>
    %15 = arith.mulf %1, %14 : vector<16x32xf32>
    %16 = vector.broadcast %11 : vector<1x32xf32> to vector<16x32xf32>
    %17 = arith.mulf %15, %16 : vector<16x32xf32>
    %18 = vector.broadcast %13 : vector<1x32xf32> to vector<16x32xf32>
    %19 = arith.addf %17, %18 : vector<16x32xf32>
    %c0_10 = arith.constant 0 : index
    %c0_11 = arith.constant 0 : index
    %c0_12 = arith.constant 0 : index
    %20 = vector.load %arg5[%c0_10, %c0_11, %c0_12] : memref<1x16x32xf32, #tpu.memory_space<vmem>>, vector<1x16x32xf32>
    %21 = vector.shape_cast %20 : vector<1x16x32xf32> to vector<16x32xf32>
    %22 = vector.shape_cast %19 : vector<16x32xf32> to vector<1x16x32xf32>
    tpu.vector_store %arg5[%c0_10, %c0_11, %c0_12], %22 {strides = array<i32>} : memref<1x16x32xf32, #tpu.memory_space<vmem>>, vector<1x16x32xf32>,
    return
  }
  func.func @transform_0(%arg0: i32, %arg1: i32) -> (i32, i32, i32) {
    %c0_i32 = arith.constant 0 : i32
    %c0_i32_0 = arith.constant 0 : i32
    return %arg0, %arg1, %c0_i32 : i32, i32, i32
  }
  func.func @transform_1(%arg0: i32, %arg1: i32) -> (i32, i32, i32) {
    %c0_i32 = arith.constant 0 : i32
    %c0_i32_0 = arith.constant 0 : i32
    %c0_i32_1 = arith.constant 0 : i32
    return %arg0, %c0_i32, %c0_i32_0 : i32, i32, i32
  }
  func.func @transform_2(%arg0: i32, %arg1: i32) -> (i32, i32, i32) {
    %c0_i32 = arith.constant 0 : i32
    %c0_i32_0 = arith.constant 0 : i32
    %c0_i32_1 = arith.constant 0 : i32
    return %arg0, %c0_i32, %c0_i32_0 : i32, i32, i32
  }
  func.func @transform_3(%arg0: i32, %arg1: i32) -> (i32, i32, i32) {
    %c0_i32 = arith.constant 0 : i32
    %c0_i32_0 = arith.constant 0 : i32
    return %arg0, %arg1, %c0_i32 : i32, i32, i32
  }
}

</mosaic_0001>

<bundles_post_ra>
// kernel: tpu_custom_call.1
= control target key start
LH: loop header
LB: loop body
LE: loop exit
PB: predicated region body
PF: predicated region fallthrough
CT: control target
= control target key end

     0   :  { %8 = vsyncpa [#allocation3], 0  ;;  %s835_s0 = inlined_call_operand.hbm [shape: f32[2,16,32], index: 0, kind: input, shape index: {}]   ;;  %s836_s1 = inlined_call_operand.vmem [shape: f32[2,1,32], index: 1, kind: input, shape index: {}]   ;;  %s837_s2 = inlined_call_operand.vmem [shape: f32[2,1,32], index: 2, kind: input, shape index: {}]   ;;  %s838_s3 = inlined_call_operand.hbm [shape: f32[2,16,32], index: 3, kind: output, shape index: {}]  }
   0x1   :  { %10 = vsyncpa [#allocation3 + $0x1], 0 }
   0x2   :  { %11 = vsyncpa [#allocation4], 0 }
   0x3   :  { %13 = vsyncpa [#allocation4 + $0x1], 0  ;;  %s644_s12 = smov 0   ;;  %s646_s13 = smov 0  }
   0x4   :  { %s648_s14 = smov 0   ;;  %s650_s15 = smov 0  }
   0x5   :  { %s652_s16 = smov 0   ;;  %s654_s17 = smov 0  }
   0x6 LB: > { %s411_s18 = sadd.s32 4294967295, %s616_s17   ;;  %s412_s19 = sadd.s32 4294967294, %s616_s17   ;;  %s616_s17 = sphi %s654_s17, %s19_s17   ;;  %s612_s16 = sphi %s652_s16, %s853_s16   ;;  %s608_s15 = sphi %s650_s15, %s852_s15   ;;  %s604_s14 = sphi %s648_s14, %s851_s14   ;;  %s600_s13 = sphi %s646_s13, %s850_s13   ;;  %s596_s12 = sphi %s644_s12, %s849_s12  }
   0x7   : > { %s31_s20 = sadd.s32 1, %s612_s16  ;;  %s40_s21 = sadd.s32 1, %s604_s14 }
   0x8   : > { %p33_p0 = scmp.ge.s32.totalorder %s31_s20, 2  ;;  %p47_p1 = scmp.ne.s32.totalorder %s604_s14, %s600_s13 }
   0x9   : > { %p48_p2 = scmp.eq.s32.totalorder %s616_s17, 0  ;;  %p53_p3 = scmp.ne.s32.totalorder %s600_s13, %s596_s12 }
   0xa   : > { %s855_s20 = smov (%p33_p0, %s31_s20), 0  ;;  %p54_p5 = scmp.eq.s32.totalorder %s411_s18, 0 }
   0xb   : > { %p685_p4 = por %p48_p2, %p47_p1  ;;  %s35_s23 = ssub.s32 %s612_s16, %s855_s20 }
   0xc   : > { %p131_p6 = scmp.eq.s32.totalorder %s411_s18, 1  ;;  %p38_p7 = scmp.eq.s32.totalorder %s35_s23, 0 }
   0xd   : > { %p691_p8 = por %p54_p5, %p53_p3  ;;  %p137_p10 = scmp.eq.s32.totalorder %s412_s19, 1 }
   0xe   : > { %p695_p9 = por %p131_p6, %p47_p1  ;;  %p442_p13 = scmp.lt.s32.totalorder %s616_s17, 2 }
   0xf   : > { %s700_s26 = scalar_select %p38_p7, %s604_s14, %s40_s21  }
  0x10   : > { %s842_s25 = scalar_select %p695_p9, 1, 0 }
  0x11   : > { %p702_p11 = por %p137_p10, %p53_p3  ;;  %s157_s28 = sand.u32 1, %s604_s14  }
  0x12   : > { %s415_s29 = sshll.u32 %s157_s28, 4  ;;  %s428_s30 = sshll.u32 %s612_s16, 8 }
  0x13   : > { %s843_s27 = scalar_select %p702_p11, 1, 0 }
  0x14   : > { %s713_s6 = scalar_lea.hbm %s835_s0, %s428_s30  ;;  %s161_s7 = scalar_lea.vmem [#allocation2], %s415_s29 }
  0x15   : > { %s170_s8 = sshll.u32 %s161_s7, 4  ;;  %p719_p0 = pnand %p442_p13, %p685_p4  ;;  %s715_s8 = int_to_ptr.vmem [resolvable:$true] %s170_s8 }
  0x16   : > { %s724_s10 = scalar_lea.sflag [#allocation3], %s157_s28  ;;  %s504_s11 = scalar_lea.hbm %s713_s6, 256 }
  0x17   : > { %p505_p2 = scmp.ne.s32.totalorder %s713_s6, %s504_s11  ;;  %p506_p3 = pneg %p719_p0 }
  0x18   : > { %s509_s21 = scalar_lea.hbm %s835_s0, 512  ;;  %p510_p4 = scmp.lt.u32.totalorder %s713_s6, %s835_s0 }
  0x19   : > { %p507_p5 = pnand %p506_p3, %p505_p2  ;;  %p511_p7 = scmp.lt.u32.totalorder %s509_s21, %s504_s11 }
  0x1a   : > { %p513_p13 = scmp.lt.u32.totalorder %s504_s11, %s713_s6 }
  0x1b   : > { %p508_p6 = pneg %p507_p5  ;;  %p512_p10 = por %p511_p7, %p510_p4 }
  0x1d   : > { %p514_p12 = por %p513_p13, %p512_p10 }
  0x1f   : > { %p515_p1 = pnand %p514_p12, %p508_p6 }
  0x21   : > { %518 = shalt.err (!%p515_p1)
}
  0x22   : > { %s519_s28 = scalar_lea.vmem %s715_s8, 256  ;;  %s618_s29 = smov [#allocation2]  }
  0x23   : > { %p520_p2 = scmp.ne.s32.totalorder %s715_s8, %s519_s28  ;;  %s524_s30 = sshll.u32 %s618_s29, 4  ;;  %s525_s30 = int_to_ptr.vmem [resolvable:$false] %s524_s30 }
  0x24   : > { %s526_s4 = scalar_lea.vmem %s525_s30, 512  ;;  %p527_p9 = scmp.lt.s32.totalorder %s715_s8, %s525_s30 }
  0x25   : > { %p522_p5 = pnand %p520_p2, %p506_p3  ;;  %p528_p4 = scmp.lt.s32.totalorder %s526_s4, %s519_s28 }
  0x27   : > { %p523_p11 = pneg %p522_p5  ;;  %p529_p7 = por %p528_p4, %p527_p9 }
  0x29   : > { %p530_p10 = pnand %p529_p7, %p523_p11 }
  0x2b   : > { %533 = shalt.err (!%p530_p10)
}
  0x2c   : > { %s619_s5 = smov 128   ;;  %s620_s7 = smov 8  }
  0x2d   : > { %437 = dma.hbm_to_vmem [thread:$0]  (!%p719_p0), %s713_s6, 256, %s715_s8, %s724_s10, %s619_s5, %s619_s5, %s620_s7  }
  0x2e   : > { %p190_p12 = scmp.lt.s32.totalorder %s616_s17, 3  ;;  %p845_p1 = scmp.ge.s32.totalorder %s616_s17, 1 }
  0x30   : > { %p191_p3 = pnand %p845_p1, %p190_p12 }
  0x31   : > { %s756_s11 = sand.u32 (!%p191_p3), 1, %s600_s13  }
  0x32   : > { %194 = sbr.rel (%p191_p3) target bundleno = 259 (0x103), region = 32  ;;  %s419_s18 = sshll.u32 (!%p191_p3), %s756_s11, 4 }
  0x33   : > { %s197_s19 = scalar_lea.sflag (!%p191_p3), [#allocation3], %s756_s11  ;;  %s200_s21 = scalar_lea.vmem (!%p191_p3), [#allocation2], %s419_s18 }
  0x39   : > { %587 = dma.done.wait (%p691_p8), %s197_s19, 256  }
  0x3a   : > { %589 = vsyncadd (%p691_p8), %s197_s19, 4294967040  ;;  %v237_v0 = vld [vmem:[%s200_s21] sm:$0xff]  ;;  %vm241_vm0 = vcmask 261120   ;;  %v238_v1 = vld [vmem:[%s200_s21 + $0x8] sm:$0xff]  ;;  %p230_p8 = scmp.lt.s32.totalorder %s608_s15, 1  ;;  %s429_s28 = sshll.u32 %s608_s15, 8 }
  0x3b   : > { %v239_v2 = vmul.f32 %v237_v0, %v237_v0  ;;  %v240_v3 = vmul.f32 %v238_v1, %v238_v1  ;;  %s228_s29 = scalar_lea.vmem [#allocation5], %s419_s18  ;;  %s783_s7 = scalar_lea.hbm %s838_s3, %s429_s28 }
  0x3c   : > { %s231_s24 = scalar_select %p230_p8, %s608_s15, 1 }
  0x3d   : > { %v242_v4 = vsel %vm241_vm0, %v239_v2, 0.0  ;;  %v245_v5 = vsel %vm241_vm0, %v240_v3, 0.0  ;;  %s306_s30 = sshll.u32 %s228_s29, 4  ;;  %s291_s15 = scalar_lea.sflag [#allocation4], %s756_s11  ;;  %s785_s30 = int_to_ptr.vmem [resolvable:$true] %s306_s30 }
  0x3e   : > { %243 = vadd.xlane.f32.xlu0 %v242_v4  ;;  %s232_s9 = scalar_lea.vmem %s836_s1, %s231_s24  ;;  %s235_s23 = scalar_lea.vmem %s837_s2, %s231_s24 }
  0x3f   : > { %v421_v22 = vld [vmem:[%s232_s9] ss:$0 sm:$0xff]  ;;  %s534_s19 = scalar_lea.vmem %s785_s30, 256  ;;  %p846_p11 = scmp.ne.s32.totalorder %s842_s25, 0 }
  0x40   : > { %v422_v25 = vld [vmem:[%s235_s23] ss:$0 sm:$0xff]  ;;  %p535_p9 = scmp.ne.s32.totalorder %s785_s30, %s534_s19  ;;  %s621_s18 = smov [#allocation5]  }
  0x41   : > { %s538_s21 = sshll.u32 %s621_s18, 4  ;;  %s539_s21 = int_to_ptr.vmem [resolvable:$false] %s538_s21 }
  0x42   : > { %246 = vadd.xlane.f32.xlu0 %v245_v5  ;;  %p536_p0 = pnand %p535_p9, %p846_p11  ;;  %s540_s24 = scalar_lea.vmem %s539_s21, 512 }
  0x43   : > { %p541_p13 = scmp.lt.s32.totalorder %s785_s30, %s539_s21  ;;  %p542_p2 = scmp.lt.s32.totalorder %s540_s24, %s534_s19 }
  0x44   : > { %p537_p6 = pneg %p536_p0 }
  0x45   : > { %p543_p5 = por %p542_p2, %p541_p13 }
  0x47   : > { %p544_p4 = pnand %p543_p5, %p537_p6 }
  0xcb   : > { %v244_v6 = vpop.xlane.xlu0 %243 }
  0xcc   : > { %496 = vrsqrt.f32 %v244_v6  ;;  %vm250_vm1 = vcmp.eq.f32.partialorder %v244_v6, inf  ;;  %v253_v10 = vand.u32 2147483648, %v244_v6  ;;  %vm252_vm2 = vcmp.eq.f32.partialorder %v244_v6, 0.0 }
  0xcf   : > { %v247_v7 = vpop.xlane.xlu0 %246 }
  0xd0   : > { %498 = vrsqrt.f32 %v247_v7  ;;  %vm257_vm3 = vcmp.eq.f32.partialorder %v247_v7, inf  ;;  %v260_v16 = vand.u32 2147483648, %v247_v7  ;;  %vm259_vm4 = vcmp.eq.f32.partialorder %v247_v7, 0.0 }
  0xd6   : > { %v497_v8 = vpop.eup %496 }
  0xd7   : > { %v249_v9 = vmul.f32 %v497_v8, %v244_v6 }
  0xd9   : > { %v251_v11 = vsel %vm250_vm1, %v244_v6, %v249_v9 }
  0xda   : > { %v499_v12 = vpop.eup %498  ;;  %v254_v13 = vsel %vm252_vm2, %v253_v10, %v251_v11 }
  0xdb   : > { %v262_v14 = vmax.f32 %v254_v13, 1e-12  ;;  %v256_v15 = vmul.f32 %v499_v12, %v247_v7 }
  0xdd   : > { %500 = vrcp.f32 %v262_v14  ;;  %v258_v17 = vsel %vm257_vm3, %v247_v7, %v256_v15 }
  0xde   : > { %v261_v18 = vsel %vm259_vm4, %v260_v16, %v258_v17 }
  0xdf   : > { %v263_v19 = vmax.f32 %v261_v18, 1e-12 }
  0xe1   : > { %502 = vrcp.f32 %v263_v19 }
  0xe7   : > { %v501_v20 = vpop.eup %500 }
  0xe8   : > { %v265_v21 = vmul.f32 5.656854, %v501_v20 }
  0xea   : > { %v270_v23 = vmul.f32 %v265_v21, %v237_v0 }
  0xeb   : > { %v503_v24 = vpop.eup %502 }
  0xec   : > { %v278_v26 = vmul.f32 %v421_v22, %v270_v23  ;;  %v267_v27 = vmul.f32 5.656854, %v503_v24 }
  0xee   : > { %v286_v28 = vadd.f32 %v422_v25, %v278_v26  ;;  %v271_v29 = vmul.f32 %v267_v27, %v238_v1 }
  0xf0   : > { %v279_v30 = vmul.f32 %v421_v22, %v271_v29  ;;  %288 = vst.msk [vmem:[%s228_s29] sm:$0xff] %vm241_vm0, %v286_v28 }
  0xf2   : > { %v287_v31 = vadd.f32 %v422_v25, %v279_v30 }
  0xf4   : > { %289 = vst.msk [vmem:[%s228_s29 + $0x8] sm:$0xff] %vm241_vm0, %v287_v31 }
  0xf5   : > { %547 = shalt.err (!%p544_p4)
}
  0xf6   : > { %s548_s6 = scalar_lea.hbm %s783_s7, 256  ;;  %s552_s10 = scalar_lea.hbm %s838_s3, 512 }
  0xf7   : > { %p549_p7 = scmp.ne.s32.totalorder %s783_s7, %s548_s6  ;;  %p553_p1 = scmp.lt.u32.totalorder %s783_s7, %s838_s3 }
  0xf8   : > { %p554_p3 = scmp.lt.u32.totalorder %s552_s10, %s548_s6  ;;  %p556_p9 = scmp.lt.u32.totalorder %s548_s6, %s783_s7 }
  0xf9   : > { %p550_p10 = pnand %p549_p7, %p846_p11 }
  0xfa   : > { %p555_p8 = por %p554_p3, %p553_p1 }
  0xfb   : > { %p551_p12 = pneg %p550_p10 }
  0xfc   : > { %p557_p0 = por %p556_p9, %p555_p8 }
  0xfe   : > { %p558_p6 = pnand %p557_p0, %p551_p12 }
 0x100   : > { %561 = shalt.err (!%p558_p6)
}
 0x101   : > { %s622_s28 = smov 128   ;;  %s623_s29 = smov 8  }
 0x102   : > { %432 = dma.vmem_to_hbm [thread:$0]  (%p846_p11), %s785_s30, 256, %s783_s7, %s291_s15, %s622_s28, %s622_s28, %s623_s29  }
 0x103 PF: > { %s321_s4 = sand.u32 1, %s596_s12   ;;  %p847_p13 = scmp.ne.s32.totalorder %s843_s27, 0 }
 0x104   : > { %p848_p2 = scmp.ge.s32.totalorder %s616_s17, 2  ;;  %s322_s5 = scalar_lea.sflag [#allocation4], %s321_s4 }
 0x106   : > { %p439_p5 = pnand %p848_p2, %p847_p13 }
 0x108   : > { %591 = dma.done.wait (!%p439_p5), %s322_s5, 256  }
 0x109   : > { %593 = vsyncadd (!%p439_p5), %s322_s5, 4294967040  ;;  %s19_s17 = sadd.s32 1, %s616_s17   ;;  %s849_s12 = smov %s600_s13 }
 0x10a   : > { %p16_p4 = scmp.ge.s32.totalorder %s19_s17, 4   ;;  %s850_s13 = smov %s604_s14 }
 0x10b   : > { %s851_s14 = smov %s700_s26  ;;  %s852_s15 = smov %s612_s16 }
 0x10c   : > { %s853_s16 = smov %s855_s20  ;;  %18 = sbr.rel (!%p16_p4) target bundleno = 6 (0x6), region = 83 }
 0x113   :  { %327 = vsyncpa [#allocation3], 1 }
 0x114   :  { %329 = vsyncpa [#allocation3 + $0x1], 1 }
 0x115   :  { %330 = vsyncpa [#allocation4], 1 }
 0x116   :  { %332 = vsyncpa [#allocation4 + $0x1], 1 }

</bundles_post_ra>
